<compile_context>
chip_gen: v7x
topology: tpu7x:2x2x1
jax: 0.10.0
libtpu: 0.0.40
codegen_flags: <defaults>
</compile_context>

<pallas_src>
import functools

import numpy as np
import jax
import jax.numpy as jnp
from jax.experimental import pallas as pl
from jax.experimental.pallas import tpu as pltpu


# --------------------------------------------------------------------------
# Budgets / small host-side helpers.
# --------------------------------------------------------------------------
_KRON_MAX_ELEMS = 2 * 1024 * 1024   # max elems of fused (H*W, OH*OW_pad) weight (~8 MiB f32)
_FALLBACK_MAX_IMAGES = 16           # static unroll bound for the fallback height pass
_ALLOW_BF16_MATMUL = False          # opt-in: feed MXU in bf16 even for f32 inputs (v5e win,
                                    # ~1e-3 rel error vs PyTorch f32 interpolation weights)


def _cdiv(a, b):
    return -(-a // b)


def _round_up(a, m):
    return _cdiv(a, m) * m


def _vmem_limit_bytes():
    """Generation-aware scoped-VMEM request (leave headroom under physical)."""
    try:
        cap = int(pltpu.get_tpu_info().vmem_capacity_bytes)
    except Exception:
        cap = 64 * 1024 * 1024
    return max(32 * 1024 * 1024, min(cap * 3 // 4, 96 * 1024 * 1024))


def _pick_rows(total, row_bytes, budget_bytes, min_blocks=1):
    """Leading (parallel) block dim: byte-budgeted, multiple of 8, and capped so
    the parallel grid axis has >= min_blocks blocks when total is large."""
    r = max(8, (budget_bytes // max(row_bytes, 1) // 8) * 8)
    if min_blocks > 1 and total > 8:
        r = min(r, max(8, _round_up(_cdiv(total, min_blocks), 8)))
    if r >= total:
        return total
    return r


def _largest_divisor(n, max_val):
    for g in range(min(n, max_val), 0, -1):
        if n % g == 0:
            return g
    return 1


# --------------------------------------------------------------------------
# Global average pool (output_size == (1, 1))
# --------------------------------------------------------------------------
def _gap_single_kernel(x_ref, o_ref, *, inv_hw):
    x = x_ref[...].astype(jnp.float32)                              # (rows, HW)
    o_ref[...] = (jnp.sum(x, axis=1, keepdims=True) * inv_hw).astype(o_ref.dtype)


def _gap_reduce_kernel(x_ref, o_ref, acc_ref, *, hw, cols, mask_tail):
    j = pl.program_id(1)
    last = pl.num_programs(1) - 1

    @pl.when(j == 0)
    def _init():
        acc_ref[...] = jnp.zeros_like(acc_ref)

    x = x_ref[...].astype(jnp.float32)                              # (rows, cols)

    if mask_tail:
        # Mask only on the tail block so the hot loop carries no extra VALU work.
        @pl.when(j < last)
        def _body():
            acc_ref[...] += jnp.sum(x, axis=1, keepdims=True)

        @pl.when(j == last)
        def _tail():
            col = j * cols + jax.lax.broadcasted_iota(jnp.int32, x.shape, 1)
            xm = jnp.where(col < hw, x, 0.0)
            acc_ref[...] += jnp.sum(xm, axis=1, keepdims=True)
    else:
        acc_ref[...] += jnp.sum(x, axis=1, keepdims=True)

    @pl.when(j == last)
    def _finalize():
        o_ref[...] = (acc_ref[...] * (1.0 / hw)).astype(o_ref.dtype)


def _gap_fold_kernel(x_ref, seg_ref, o_ref, *, inv_hw):
    # Segmented reduction on the MXU: (rows, g*HW) @ (g*HW, g) ones-per-segment.
    x = x_ref[...].astype(seg_ref.dtype)
    s = jnp.dot(x, seg_ref[...], preferred_element_type=jnp.float32)
    o_ref[...] = (s * inv_hw).astype(o_ref.dtype)


def _gap_folded(x, g, limit):
    N, C, H, W = x.shape
    NC, HW = N * C, H * W
    M = NC // g
    isz = jnp.dtype(x.dtype).itemsize
    budget = limit // 6

    x2 = x.reshape(M, g * HW)
    w_dtype = jnp.bfloat16 if x.dtype == jnp.bfloat16 else jnp.float32
    seg = np.zeros((g * HW, g), np.float32)
    seg[np.arange(g * HW), np.arange(g * HW) // HW] = 1.0
    seg = jnp.asarray(seg, dtype=w_dtype)

    rows = _pick_rows(M, (g * HW) * isz, budget, min_blocks=2)
    out = pl.pallas_call(
        functools.partial(_gap_fold_kernel, inv_hw=1.0 / HW),
        out_shape=jax.ShapeDtypeStruct((M, g), x.dtype),
        grid_spec=pltpu.PrefetchScalarGridSpec(
            num_scalar_prefetch=0,
            grid=(_cdiv(M, rows),),
            in_specs=[pl.BlockSpec((rows, g * HW), lambda i: (i, 0)),
                      pl.BlockSpec((g * HW, g), lambda i: (0, 0))],
            out_specs=pl.BlockSpec((rows, g), lambda i: (i, 0)),
        ),
        compiler_params=pltpu.CompilerParams(
            dimension_semantics=("parallel",),
            vmem_limit_bytes=limit),
    )(x2, seg)
    return out.reshape(N, C, 1, 1)


def _global_avg_pool(x, *, block_bytes=None):
    N, C, H, W = x.shape
    NC, HW = N * C, H * W
    isz = jnp.dtype(x.dtype).itemsize
    limit = _vmem_limit_bytes()
    budget = block_bytes if block_bytes is not None else limit // 6

    # Small spatial maps: fold channel-rows together so the lane dim is dense.
    if HW < 128:
        g = _largest_divisor(NC, max_val=min(NC, max(1, 4096 // HW)))
        if g > 1:
            return _gap_folded(x, g, limit)

    x2 = x.reshape(NC, HW)

    if HW * isz <= budget:
        # Whole spatial extent in one block: no reduction grid axis needed.
        rows = _pick_rows(NC, HW * isz, budget, min_blocks=2)
        out = pl.pallas_call(
            functools.partial(_gap_single_kernel, inv_hw=1.0 / HW),
            out_shape=jax.ShapeDtypeStruct((NC, 1), x.dtype),
            grid_spec=pltpu.PrefetchScalarGridSpec(
                num_scalar_prefetch=0,
                grid=(_cdiv(NC, rows),),
                in_specs=[pl.BlockSpec((rows, HW), lambda i: (i, 0))],
                out_specs=pl.BlockSpec((rows, 1), lambda i: (i, 0)),
            ),
            compiler_params=pltpu.CompilerParams(
                dimension_semantics=("parallel",),
                vmem_limit_bytes=limit),
        )(x2)
        return out.reshape(N, C, 1, 1)

    # Huge spatial maps: tiled reduction over HW (reduction axis last).
    cols = max(128, ((budget // (8 * isz)) // 128) * 128)
    rows = _pick_rows(NC, cols * isz, budget, min_blocks=2)
    mask_tail = (HW % cols) != 0
    out = pl.pallas_call(
        functools.partial(_gap_reduce_kernel, hw=HW, cols=cols, mask_tail=mask_tail),
        out_shape=jax.ShapeDtypeStruct((NC, 1), x.dtype),
        grid_spec=pltpu.PrefetchScalarGridSpec(
            num_scalar_prefetch=0,
            grid=(_cdiv(NC, rows), _cdiv(HW, cols)),
            in_specs=[pl.BlockSpec((rows, cols), lambda i, j: (i, j))],
            out_specs=pl.BlockSpec((rows, 1), lambda i, j: (i, 0)),
            scratch_shapes=[pltpu.VMEM((rows, 1), jnp.float32)],
        ),
        compiler_params=pltpu.CompilerParams(
            dimension_semantics=("parallel", "arbitrary"),
            vmem_limit_bytes=limit),
    )(x2)
    return out.reshape(N, C, 1, 1)


# --------------------------------------------------------------------------
# Bilinear interpolation matrices (PyTorch align_corners=False), host-side numpy.
# --------------------------------------------------------------------------
def _bilinear_matrix_np(in_size, out_size):
    scale = in_size / out_size
    dst = np.arange(out_size, dtype=np.float64)
    src = np.maximum((dst + 0.5) * scale - 0.5, 0.0)      # PyTorch clamps low side
    i0 = np.minimum(np.floor(src), in_size - 1).astype(np.int64)
    lam = (src - i0).astype(np.float32)
    i1 = np.minimum(i0 + 1, in_size - 1)
    m = np.zeros((out_size, in_size), np.float32)
    rows = np.arange(out_size)
    np.add.at(m, (rows, i0), 1.0 - lam)
    np.add.at(m, (rows, i1), lam)
    return m


# --------------------------------------------------------------------------
# Fused bilinear resize: one MXU matmul per batch-of-images block.
#   out[b, oh*OW+ow] = sum_{h,w} x[b, h*W+w] * Wh[oh,h] * Ww[ow,w]
# --------------------------------------------------------------------------
def _resize_kron_kernel(x_ref, w_ref, o_ref):
    x = x_ref[...].astype(w_ref.dtype)
    o_ref[...] = jnp.dot(x, w_ref[...],
                         preferred_element_type=jnp.float32).astype(o_ref.dtype)


def _bilinear_resize_fused(x, out_hw, ohow_pad):
    N, C, H, W = x.shape
    OH, OW = out_hw
    NC, HW, OHOW = N * C, H * W, OH * OW
    isz = jnp.dtype(x.dtype).itemsize
    limit = _vmem_limit_bytes()

    wh = _bilinear_matrix_np(H, OH)                       # (OH, H)
    ww = _bilinear_matrix_np(W, OW)                       # (OW, W)
    wk = np.einsum("oh,pw->hwop", wh, ww).reshape(HW, OHOW)
    if ohow_pad != OHOW:                                  # lane-dense output stores
        wk = np.concatenate([wk, np.zeros((HW, ohow_pad - OHOW), np.float32)], axis=1)
    use_bf16 = (x.dtype == jnp.bfloat16) or _ALLOW_BF16_MATMUL
    w_dtype = jnp.bfloat16 if use_bf16 else jnp.float32
    wk = jnp.asarray(wk, dtype=w_dtype)
    w_bytes = HW * ohow_pad * jnp.dtype(w_dtype).itemsize

    x2 = x.reshape(NC, HW)
    # x/out blocks are double-buffered; the weight stays resident.
    budget = max(limit // 8, (limit - 2 * w_bytes) // 6)
    B = _pick_rows(NC, (HW + ohow_pad) * isz, budget, min_blocks=2)

    out = pl.pallas_call(
        _resize_kron_kernel,
        out_shape=jax.ShapeDtypeStruct((NC, ohow_pad), x.dtype),
        grid_spec=pltpu.PrefetchScalarGridSpec(
            num_scalar_prefetch=0,
            grid=(_cdiv(NC, B),),
            in_specs=[pl.BlockSpec((B, HW), lambda g: (g, 0)),
                      pl.BlockSpec((HW, ohow_pad), lambda g: (0, 0))],
            out_specs=pl.BlockSpec((B, ohow_pad), lambda g: (g, 0)),
        ),
        compiler_params=pltpu.CompilerParams(
            dimension_semantics=("parallel",),
            vmem_limit_bytes=limit),
    )(x2, wk)
    if ohow_pad != OHOW:
        out = out[:, :OHOW]
    return out.reshape(N, C, OH, OW)


# --------------------------------------------------------------------------
# Fallback for very large resizes: one big width-pass matmul per block, then a
# short unrolled per-image height pass.
# --------------------------------------------------------------------------
def _resize_twomm_kernel(x_ref, wh_ref, wwt_ref, o_ref):
    B, H, W = x_ref.shape
    OW = wwt_ref.shape[1]
    x = x_ref[...].astype(wwt_ref.dtype)
    # Width pass: M = B*H keeps the MXU pipeline full, one RHS push per block.
    xw = jnp.dot(x.reshape(B * H, W), wwt_ref[...],
                 preferred_element_type=jnp.float32)                  # (B*H, OW)
    xw = xw.astype(wh_ref.dtype)
    # Height pass: small per-image matmuls (short static unroll).
    for b in range(B):
        tb = xw[b * H:(b + 1) * H, :]                                 # (H, OW)
        o_ref[b] = jnp.dot(wh_ref[...], tb,
                           preferred_element_type=jnp.float32).astype(o_ref.dtype)


def _bilinear_resize_twostep(x, out_hw):
    N, C, H, W = x.shape
    OH, OW = out_hw
    NC = N * C
    isz = jnp.dtype(x.dtype).itemsize
    limit = _vmem_limit_bytes()
    budget = limit // 6

    use_bf16 = (x.dtype == jnp.bfloat16) or _ALLOW_BF16_MATMUL
    w_dtype = jnp.bfloat16 if use_bf16 else jnp.float32
    wh = jnp.asarray(_bilinear_matrix_np(H, OH), dtype=w_dtype)       # (OH, H)
    wwt = jnp.asarray(_bilinear_matrix_np(W, OW).T, dtype=w_dtype)    # (W, OW)

    xb = x.reshape(NC, H, W)
    per_img = (H * W + OH * OW) * isz + H * OW * 4                    # incl. f32 intermediate
    B = int(max(1, min(_FALLBACK_MAX_IMAGES, budget // per_img, NC)))
    if NC > 1:
        B = min(B, max(1, _cdiv(NC, 2)))                              # feed both v7x cores

    out = pl.pallas_call(
        _resize_twomm_kernel,
        out_shape=jax.ShapeDtypeStruct((NC, OH, OW), x.dtype),
        grid_spec=pltpu.PrefetchScalarGridSpec(
            num_scalar_prefetch=0,
            grid=(_cdiv(NC, B),),
            in_specs=[pl.BlockSpec((B, H, W), lambda g: (g, 0, 0)),
                      pl.BlockSpec((OH, H), lambda g: (0, 0)),
                      pl.BlockSpec((W, OW), lambda g: (0, 0))],
            out_specs=pl.BlockSpec((B, OH, OW), lambda g: (g, 0, 0)),
        ),
        compiler_params=pltpu.CompilerParams(
            dimension_semantics=("parallel",),
            vmem_limit_bytes=limit),
    )(xb, wh, wwt)
    return out.reshape(N, C, OH, OW)


def _bilinear_resize(x, out_hw):
    _, _, H, W = x.shape
    OH, OW = out_hw
    HW, OHOW = H * W, OH * OW
    ohow_pad = _round_up(OHOW, 128)
    if HW * ohow_pad <= _KRON_MAX_ELEMS:          # fused, lane-dense output
        return _bilinear_resize_fused(x, out_hw, ohow_pad)
    if HW * OHOW <= _KRON_MAX_ELEMS:              # fused, unpadded weight
        return _bilinear_resize_fused(x, out_hw, OHOW)
    return _bilinear_resize_twostep(x, out_hw)


# --------------------------------------------------------------------------
# Public wrapper (matches AdaptiveAvgPool2dCustom.forward)
# --------------------------------------------------------------------------
@functools.partial(jax.jit, static_argnames=("output_size",))
def adaptive_avg_pool2d_custom(x, output_size):
    """x: (N, C, H, W) NCHW. Returns (N, C, out_h, out_w)."""
    if isinstance(output_size, int):
        output_size = (output_size, output_size)
    output_size = tuple(output_size)
    if output_size == (1, 1):
        return _global_avg_pool(x)
    return _bilinear_resize(x, output_size)


# --------------------------------------------------------------------------
# Pure-JAX references (self-check only)
# --------------------------------------------------------------------------
def _ref_global_pool(x):
    return jnp.mean(x.astype(jnp.float32), axis=(2, 3), keepdims=True).astype(x.dtype)


def _ref_resize(x, output_size):
    OH, OW = output_size
    _, _, H, W = x.shape
    wh = jnp.asarray(_bilinear_matrix_np(H, OH))
    ww = jnp.asarray(_bilinear_matrix_np(W, OW))
    return jnp.einsum("oh,nchw,pw->ncop", wh, x.astype(jnp.float32), ww).astype(x.dtype)


if __name__ == "__main__":
    key = jax.random.PRNGKey(0)
    x = jax.random.normal(key, (2, 4, 16, 16), dtype=jnp.float32)

    # Path 1: output_size = 1 -> global average pool, shape (2, 4, 1, 1)
    y1 = jax.block_until_ready(adaptive_avg_pool2d_custom(x, 1))
    assert y1.shape == (2, 4, 1, 1)
    assert jnp.allclose(y1, _ref_global_pool(x), atol=1e-5, rtol=1e-5)

    # Path 2: output_size = 8 -> bilinear downsample (align_corners=False) + identity pool
    y2 = jax.block_until_ready(adaptive_avg_pool2d_custom(x, 8))
    assert y2.shape == (2, 4, 8, 8)
    assert jnp.allclose(y2, _ref_resize(x, (8, 8)), atol=1e-5, rtol=1e-5)

    # Path 3: upsample to (24, 24) exercises interpolation weights + padded output lanes
    y3 = jax.block_until_ready(adaptive_avg_pool2d_custom(x, (24, 24)))
    assert y3.shape == (2, 4, 24, 24)
    assert jnp.allclose(y3, _ref_resize(x, (24, 24)), atol=1e-5, rtol=1e-5)

    # Large-resize fallback kernel (restructured width/height passes).
    y4 = jax.block_until_ready(_bilinear_resize_twostep(x, (8, 8)))
    assert jnp.allclose(y4, _ref_resize(x, (8, 8)), atol=1e-5, rtol=1e-5)

    # GAP folded path for small spatial maps (HW < 128): MXU segment-sum.
    x5 = jax.random.normal(key, (2, 4, 7, 7), dtype=jnp.float32)
    y5 = jax.block_until_ready(adaptive_avg_pool2d_custom(x5, 1))
    assert y5.shape == (2, 4, 1, 1)
    assert jnp.allclose(y5, _ref_global_pool(x5), atol=1e-5, rtol=1e-5)

    # GAP tiled-reduction path with a non-128-multiple tail (mask gated to last step);
    # force it by overriding the per-block byte budget.
    x6 = jax.random.normal(key, (2, 4, 16, 41), dtype=jnp.float32)
    y6 = jax.block_until_ready(_global_avg_pool(x6, block_bytes=1024))
    assert jnp.allclose(y6, _ref_global_pool(x6), atol=1e-5, rtol=1e-5)

    print("KERNEL_OK")
</pallas_src>

<mosaic_0001>
module attributes {stable_mosaic.version = 11 : i64} {
  func.func @_gap_single_kernel(%arg0: i32, %arg1: memref<8x256xf32, #tpu.memory_space<vmem>>, %arg2: memref<8x1xf32, #tpu.memory_space<vmem>>) attributes {dimension_semantics = [#tpu.dimension_semantics<parallel>], iteration_bounds = array<i64: 1>, scalar_prefetch = 0 : i64, scratch_operands = 0 : i64, tpu.core_type = #tpu.core_type<tc>, window_params = [{transform_indices = @transform_0, window_bounds = array<i64: 8, 256>}, {transform_indices = @transform_1, window_bounds = array<i64: 8, 1>}]} {
    %c0 = arith.constant 0 : index
    %c0_0 = arith.constant 0 : index
    %0 = vector.load %arg1[%c0, %c0_0] : memref<8x256xf32, #tpu.memory_space<vmem>>, vector<8x256xf32>
    %cst = arith.constant dense<0.000000e+00> : vector<8xf32>
    %1 = vector.multi_reduction <add>, %0, %cst [1] : vector<8x256xf32> to vector<8xf32>
    %2 = vector.shape_cast %1 : vector<8xf32> to vector<8x1xf32>
    %cst_1 = arith.constant 3.906250e-03 : f32
    %3 = vector.broadcast %cst_1 : f32 to vector<8x1xf32>
    %4 = arith.mulf %2, %3 : vector<8x1xf32>
    %c0_2 = arith.constant 0 : index
    %c0_3 = arith.constant 0 : index
    %5 = vector.load %arg2[%c0_2, %c0_3] : memref<8x1xf32, #tpu.memory_space<vmem>>, vector<8x1xf32>
    tpu.vector_store %arg2[%c0_2, %c0_3], %4 {strides = array<i32>} : memref<8x1xf32, #tpu.memory_space<vmem>>, vector<8x1xf32>,
    return
  }
  func.func @transform_0(%arg0: i32) -> (i32, i32) {
    %c0_i32 = arith.constant 0 : i32
    %c0_i32_0 = arith.constant 0 : i32
    return %arg0, %c0_i32 : i32, i32
  }
  func.func @transform_1(%arg0: i32) -> (i32, i32) {
    %c0_i32 = arith.constant 0 : i32
    %c0_i32_0 = arith.constant 0 : i32
    return %arg0, %c0_i32 : i32, i32
  }
}

</mosaic_0001>

<bundles_post_ra>
// kernel: adaptive_avg_pool2d_custom.1
= control target key start
LH: loop header
LB: loop body
LE: loop exit
PB: predicated region body
PF: predicated region fallthrough
CT: control target
= control target key end

     0   :  { %vm14_vm0 = vcmask 7168   ;;  %s39_s0 = inlined_call_operand.vmem [shape: f32[8,256], index: 0, kind: input, shape index: {}]   ;;  %s40_s1 = inlined_call_operand.vmem [shape: f32[8,1], index: 1, kind: output, shape index: {}]  }
   0x1   :  { %v8_v0 = vld [vmem:[%s39_s0] sm:$0xff]  ;;  %v9_v1 = vld [vmem:[%s39_s0 + $0x8] sm:$0xff] }
   0x2   :  { %v10_v2 = vadd.f32 %v9_v1, %v8_v0 }
   0x4   :  { %11 = vadd.xlane.f32.xlu0 %v10_v2 }
  0x91   :  { %v12_v3 = vpop.xlane.xlu0 %11 }
  0x92   :  { %v13_v4 = vmul.f32 0.00390625, %v12_v3 }
  0x94   :  { %15 = vst.msk [vmem:[%s40_s1] sm:$0xff] %vm14_vm0, %v13_v4 }

</bundles_post_ra>
